<compile_context>
chip_gen: v7x
topology: tpu7x:2x2x1
jax: 0.10.0
libtpu: 0.0.40
codegen_flags: <defaults>
</compile_context>

<pallas_src>
from functools import lru_cache, partial

import numpy as np
import jax
import jax.numpy as jnp
from jax.experimental import pallas as pl
from jax.experimental.pallas import tpu as pltpu


# ----------------------------------------------------------------------------
# Host-side construction of the linear operators (glue, cached per config).
# ----------------------------------------------------------------------------
@lru_cache(maxsize=32)
def _build_weights(kernel_sizes, L, period):
    """Returns (W_avg, W_sea), both (L, L) float32."""
    # --- W_avg: mean over kernels of (replicate-pad + AvgPool1d(k, stride=1)).
    W_avg = np.zeros((L, L), dtype=np.float64)
    for k in kernel_sizes:
        front = k // 2 if k % 2 == 0 else (k - 1) // 2
        rows = np.repeat(np.arange(L)[:, None], k, axis=1)              # (L, k)
        cols = np.clip(rows + np.arange(k)[None, :] - front, 0, L - 1)  # (L, k)
        Wk = np.zeros((L, L), dtype=np.float64)
        np.add.at(Wk, (rows, cols), 1.0 / k)      # accumulate clipped (edge) taps
        W_avg += Wk
    W_avg /= len(kernel_sizes)

    # --- seasonal operator: W_sea = T @ (I_P - 1/P) @ Pavg @ (I - W_avg)
    t = np.arange(L)
    r = t % period
    counts = np.bincount(r, minlength=period).astype(np.float64)
    Pavg = np.zeros((period, L), dtype=np.float64)
    Pavg[r, t] = 1.0 / counts[r]
    C = np.eye(period) - 1.0 / period
    T = np.zeros((L, period), dtype=np.float64)
    T[t, r] = 1.0
    W_sea = T @ C @ Pavg @ (np.eye(L) - W_avg)

    return W_avg.astype(np.float32), W_sea.astype(np.float32)


@lru_cache(maxsize=64)
def _build_stacked_weights(kernel_sizes, L, period, tl):
    """Stacked operator: for each row-tile l the rows [2*l*tl, 2*(l+1)*tl)
    contain tl rows of W_avg followed by tl rows of W_sea (tile-interleaved),
    so one (2*tl, L) block feeds a single MXU matmul per output tile."""
    W_avg, W_sea = _build_weights(kernel_sizes, L, period)
    nb = L // tl
    Wa = W_avg.reshape(nb, tl, L)
    Ws = W_sea.reshape(nb, tl, L)
    return np.concatenate([Wa, Ws], axis=1).reshape(2 * L, L)


# ----------------------------------------------------------------------------
# Tile / VMEM sizing helpers (all trace-time python on static shapes).
# ----------------------------------------------------------------------------
def _vmem_budget():
    """(working-set budget, hard vmem_limit cap) from the actual chip VMEM."""
    try:
        cap = int(pltpu.get_tpu_info().vmem_capacity_bytes)
    except Exception:
        cap = 64 << 20            # conservative fallback = v7x per-TC VMEM
    return (cap * 3) // 5, (cap * 17) // 20


def _required_vmem(tl, tn, L, cbytes, xbytes, obytes):
    w = 2 * (2 * tl) * L * cbytes                 # stacked W row slab, double-buffered
    xb = 2 * L * tn * xbytes                      # full-L x slab, double-buffered
    outs = 3 * 2 * tl * tn * obytes               # trend/season/resid tiles, double-buffered
    tmp = 5 * tl * tn * 4 + L * tn * (cbytes + xbytes)   # in-kernel f32 + cast temporaries
    return w + xb + outs + tmp


def _aligned_divisors(total, align, cap=None):
    """Divisors of `total`, multiples of `align` (or == total), descending."""
    cap = total if cap is None else min(cap, total)
    divs = [d for d in range(cap, 0, -1)
            if total % d == 0 and (d % align == 0 or d == total)]
    return divs or [total]


def _fit_tiles(L, Np, cbytes, xbytes, obytes, budget, row_align,
               max_tl=None, max_tn=None):
    """Largest tiles (prefer full-L rows) whose working set fits `budget`."""
    tls = _aligned_divisors(L, row_align, max_tl)
    tns = _aligned_divisors(Np, 128, max_tn)
    i = j = 0

    def need(a, b):
        return _required_vmem(tls[a], tns[b], L, cbytes, xbytes, obytes)

    while need(i, j) > budget:
        if j + 1 < len(tns) and tns[j] > 512:
            j += 1
        elif i + 1 < len(tls) and tls[i] > 256:
            i += 1
        elif j + 1 < len(tns):
            j += 1
        elif i + 1 < len(tls):
            i += 1
        else:
            break
    return tls[i], tns[j]


# ----------------------------------------------------------------------------
# Pallas kernel: one (2*tl, L) stacked-W slab against one (L, tn) x slab.
# ----------------------------------------------------------------------------
def _decomp_kernel(w_ref, x_ref, trend_ref, season_ref, resid_ref):
    tl = trend_ref.shape[0]
    cdt = w_ref.dtype

    # Single MXU matmul producing [trend; season] rows for this tile.
    y = jnp.dot(w_ref[...], x_ref[...].astype(cdt),
                preferred_element_type=jnp.float32)           # (2*tl, tn)
    trend = y[:tl, :]
    season = y[tl:, :]

    # Residual from the ORIGINAL-precision x rows of this tile.
    row0 = pl.multiple_of(pl.program_id(1) * tl, tl)
    x_rows = x_ref[pl.ds(row0, tl), :].astype(jnp.float32)    # (tl, tn)

    trend_ref[...] = trend.astype(trend_ref.dtype)
    season_ref[...] = season.astype(season_ref.dtype)
    resid_ref[...] = (x_rows - trend - season).astype(resid_ref.dtype)


# ----------------------------------------------------------------------------
# jit'd wrapper (all config static -> weights become device-resident constants)
# ----------------------------------------------------------------------------
@partial(jax.jit, static_argnames=("kernel_sizes", "period", "compute_dtype",
                                   "out_dtype", "max_tile_l", "max_tile_n"))
def _tsr_decomp_jit(x, *, kernel_sizes, period, compute_dtype, out_dtype,
                    max_tile_l, max_tile_n):
    B, L, D = x.shape
    cdt = jnp.dtype(compute_dtype)
    odt = jnp.dtype(out_dtype) if out_dtype is not None else jnp.dtype(x.dtype)

    # Layout: operate directly on (B, L, D) when the channel axis is lane-dense;
    # otherwise fold the batch into the lane axis (L, B*D) as a fallback.
    direct = (D % 128 == 0)
    if direct:
        Bp, Np = B, D
        x3 = x
    else:
        Bp, Np = 1, B * D
        x3 = jnp.transpose(x, (1, 0, 2)).reshape(1, L, B * D)

    cbytes = cdt.itemsize
    xbytes = jnp.dtype(x.dtype).itemsize
    obytes = odt.itemsize
    row_align = max(8, 32 // max(cbytes, 1))     # 16 for bf16, 8 for f32, 32 for 1B

    budget, limit_cap = _vmem_budget()
    tl, tn = _fit_tiles(L, Np, cbytes, xbytes, obytes, budget, row_align,
                        max_tile_l, max_tile_n)

    # v7x megacore: make sure the grid has >= 2 tiles along some parallel axis.
    if Bp * (L // tl) * (Np // tn) < 2:
        if Np % 256 == 0 and (max_tile_n is None or Np // 2 <= max_tile_n):
            tn = Np // 2
        elif tl == L and L % (2 * row_align) == 0:
            tl = L // 2

    need = _required_vmem(tl, tn, L, cbytes, xbytes, obytes)
    vmem_limit = int(min(max(need + (8 << 20), 32 << 20), limit_cap))

    w = jnp.asarray(_build_stacked_weights(kernel_sizes, L, period, tl), dtype=cdt)

    out_sds = jax.ShapeDtypeStruct((Bp, L, Np), odt)
    grid = (Bp, L // tl, Np // tn)

    trend3, season3, resid3 = pl.pallas_call(
        _decomp_kernel,
        out_shape=(out_sds, out_sds, out_sds),
        grid=grid,
        in_specs=[
            # stacked [W_avg; W_sea] rows for output tile l (b/n-invariant)
            pl.BlockSpec((2 * tl, L), lambda b, l, n: (l, 0)),
            # full-L, lane-dense x column slab (batch dim squeezed)
            pl.BlockSpec((None, L, tn), lambda b, l, n: (b, 0, n)),
        ],
        out_specs=(
            pl.BlockSpec((None, tl, tn), lambda b, l, n: (b, l, n)),
            pl.BlockSpec((None, tl, tn), lambda b, l, n: (b, l, n)),
            pl.BlockSpec((None, tl, tn), lambda b, l, n: (b, l, n)),
        ),
        compiler_params=pltpu.CompilerParams(
            dimension_semantics=("parallel", "parallel", "parallel"),
            vmem_limit_bytes=vmem_limit),
    )(w, x3)

    if direct:
        return trend3, season3, resid3

    def unfold(y):
        return jnp.transpose(y.reshape(L, B, D), (1, 0, 2))

    return unfold(trend3), unfold(season3), unfold(resid3)


def tsr_decomp(x, kernel_sizes, period, *, compute_dtype=jnp.bfloat16,
               out_dtype=None, max_tile_l=None, max_tile_n=None):
    """Returns (trend_init, seasonal_init, resid_init), each shaped like x (B, L, D)."""
    return _tsr_decomp_jit(
        x,
        kernel_sizes=tuple(int(k) for k in kernel_sizes),
        period=int(period),
        compute_dtype=compute_dtype,
        out_dtype=out_dtype,
        max_tile_l=max_tile_l,
        max_tile_n=max_tile_n)


# ----------------------------------------------------------------------------
# Pure-JAX reference reproducing the PyTorch semantics literally.
# ----------------------------------------------------------------------------
def _reference(x, kernel_sizes, period):
    B, L, D = x.shape
    means, res_list = [], []
    for k in kernel_sizes:
        front = k // 2 if k % 2 == 0 else (k - 1) // 2
        end = (k - 1) // 2
        xp = jnp.concatenate(
            [jnp.repeat(x[:, 0:1, :], front, axis=1), x,
             jnp.repeat(x[:, -1:, :], end, axis=1)], axis=1)
        windows = jnp.stack([xp[:, j:j + L, :] for j in range(k)], axis=0)
        ma = jnp.mean(windows, axis=0)
        means.append(ma)
        res_list.append(x - ma)
    res = sum(res_list) / len(res_list)
    trend = sum(means) / len(means)

    seas = [jnp.mean(res[:, j::period, :], axis=1, keepdims=True)
            for j in range(period)]
    seasonal = jnp.concatenate(seas, axis=1)                       # (B, P, D)
    seasonal = seasonal - jnp.mean(seasonal, axis=1, keepdims=True)
    reps = L // period + 1
    seasonal_init = jnp.tile(seasonal, (1, reps, 1))[:, :L, :]
    resid = res - seasonal_init
    return trend, seasonal_init, resid


if __name__ == "__main__":
    kernel_sizes = (2, 3, 5)      # covers even- and odd-kernel padding
    period = 6                    # does not divide L -> exercises count logic
    B, L, D = 2, 64, 128          # D % 128 == 0 -> direct (B, L, D) lane-dense path

    key = jax.random.PRNGKey(0)
    x = jax.random.normal(key, (B, L, D), dtype=jnp.float32)
    ref = _reference(x, kernel_sizes, period)

    # f32 compute path with forced row tiling (exercises stacked/interleaved W
    # and the dynamic row slice): tight check against the reference.
    out_f32 = tsr_decomp(x, kernel_sizes, period,
                         compute_dtype=jnp.float32, max_tile_l=32)
    jax.block_until_ready(out_f32)
    for got, want in zip(out_f32, ref):
        np.testing.assert_allclose(np.asarray(got), np.asarray(want),
                                   rtol=5e-4, atol=5e-4)

    # Default bf16 MXU-operand path, full-L-resident W.
    out_bf16 = tsr_decomp(x, kernel_sizes, period)
    jax.block_until_ready(out_bf16)
    for got, want in zip(out_bf16, ref):
        np.testing.assert_allclose(np.asarray(got), np.asarray(want),
                                   rtol=5e-2, atol=5e-2)

    # Fallback layout path (channels not a multiple of 128 -> batch folded).
    xf = jax.random.normal(jax.random.PRNGKey(1), (2, 48, 32), dtype=jnp.float32)
    reff = _reference(xf, kernel_sizes, period)
    outf = tsr_decomp(xf, kernel_sizes, period, compute_dtype=jnp.float32)
    jax.block_until_ready(outf)
    for got, want in zip(outf, reff):
        np.testing.assert_allclose(np.asarray(got), np.asarray(want),
                                   rtol=5e-4, atol=5e-4)

    for o in out_f32:
        assert o.shape == (B, L, D) and o.dtype == x.dtype
    print("KERNEL_OK")
</pallas_src>

<mosaic_0001>
module attributes {stable_mosaic.version = 11 : i64} {
  func.func @_decomp_kernel(%arg0: i32, %arg1: i32, %arg2: i32, %arg3: memref<64x64xf32, #tpu.memory_space<vmem>>, %arg4: memref<1x64x128xf32, #tpu.memory_space<vmem>>, %arg5: memref<1x32x128xf32, #tpu.memory_space<vmem>>, %arg6: memref<1x32x128xf32, #tpu.memory_space<vmem>>, %arg7: memref<1x32x128xf32, #tpu.memory_space<vmem>>) attributes {dimension_semantics = [#tpu.dimension_semantics<parallel>, #tpu.dimension_semantics<parallel>, #tpu.dimension_semantics<parallel>], iteration_bounds = array<i64: 2, 2, 1>, scalar_prefetch = 0 : i64, scratch_operands = 0 : i64, tpu.core_type = #tpu.core_type<tc>, window_params = [{transform_indices = @transform_0, window_bounds = array<i64: 64, 64>}, {transform_indices = @transform_1, window_bounds = array<i64: 1, 64, 128>}, {transform_indices = @transform_2, window_bounds = array<i64: 1, 32, 128>}, {transform_indices = @transform_3, window_bounds = array<i64: 1, 32, 128>}, {transform_indices = @transform_4, window_bounds = array<i64: 1, 32, 128>}]} {
    %c0 = arith.constant 0 : index
    %c0_0 = arith.constant 0 : index
    %0 = vector.load %arg3[%c0, %c0_0] : memref<64x64xf32, #tpu.memory_space<vmem>>, vector<64x64xf32>
    %c0_1 = arith.constant 0 : index
    %c0_2 = arith.constant 0 : index
    %c0_3 = arith.constant 0 : index
    %1 = vector.load %arg4[%c0_1, %c0_2, %c0_3] : memref<1x64x128xf32, #tpu.memory_space<vmem>>, vector<1x64x128xf32>
    %2 = vector.shape_cast %1 : vector<1x64x128xf32> to vector<64x128xf32>
    %cst = arith.constant dense<0.000000e+00> : vector<64x128xf32>
    %3 = tpu.matmul %0, %2, %cst {dimension_numbers = #tpu.dot_dimension_numbers<[1], [0], [0], [1], [0, 0, 1, 1], [], []>} : vector<64x64xf32>, vector<64x128xf32>, vector<64x128xf32> -> vector<64x128xf32>
    %4 = vector.extract_strided_slice %3 {offsets = [0, 0], sizes = [32, 128], strides = [1, 1]} : vector<64x128xf32> to vector<32x128xf32>
    %5 = vector.extract_strided_slice %3 {offsets = [32, 0], sizes = [32, 128], strides = [1, 1]} : vector<64x128xf32> to vector<32x128xf32>
    %c32_i32 = arith.constant 32 : i32
    %6 = arith.muli %arg1, %c32_i32 : i32
    %7 = tpu.assume_multiple %6, 32 : i32
    %c0_4 = arith.constant 0 : index
    %8 = arith.index_cast %7 : i32 to index
    %c0_5 = arith.constant 0 : index
    %9 = vector.load %arg4[%c0_4, %8, %c0_5] : memref<1x64x128xf32, #tpu.memory_space<vmem>>, vector<1x32x128xf32>
    %10 = vector.shape_cast %9 : vector<1x32x128xf32> to vector<32x128xf32>
    %c0_6 = arith.constant 0 : index
    %c0_7 = arith.constant 0 : index
    %c0_8 = arith.constant 0 : index
    %11 = vector.load %arg5[%c0_6, %c0_7, %c0_8] : memref<1x32x128xf32, #tpu.memory_space<vmem>>, vector<1x32x128xf32>
    %12 = vector.shape_cast %11 : vector<1x32x128xf32> to vector<32x128xf32>
    %13 = vector.shape_cast %4 : vector<32x128xf32> to vector<1x32x128xf32>
    tpu.vector_store %arg5[%c0_6, %c0_7, %c0_8], %13 {strides = array<i32>} : memref<1x32x128xf32, #tpu.memory_space<vmem>>, vector<1x32x128xf32>,
    %c0_9 = arith.constant 0 : index
    %c0_10 = arith.constant 0 : index
    %c0_11 = arith.constant 0 : index
    %14 = vector.load %arg6[%c0_9, %c0_10, %c0_11] : memref<1x32x128xf32, #tpu.memory_space<vmem>>, vector<1x32x128xf32>
    %15 = vector.shape_cast %14 : vector<1x32x128xf32> to vector<32x128xf32>
    %16 = vector.shape_cast %5 : vector<32x128xf32> to vector<1x32x128xf32>
    tpu.vector_store %arg6[%c0_9, %c0_10, %c0_11], %16 {strides = array<i32>} : memref<1x32x128xf32, #tpu.memory_space<vmem>>, vector<1x32x128xf32>,
    %17 = arith.subf %10, %4 : vector<32x128xf32>
    %18 = arith.subf %17, %5 : vector<32x128xf32>
    %c0_12 = arith.constant 0 : index
    %c0_13 = arith.constant 0 : index
    %c0_14 = arith.constant 0 : index
    %19 = vector.load %arg7[%c0_12, %c0_13, %c0_14] : memref<1x32x128xf32, #tpu.memory_space<vmem>>, vector<1x32x128xf32>
    %20 = vector.shape_cast %19 : vector<1x32x128xf32> to vector<32x128xf32>
    %21 = vector.shape_cast %18 : vector<32x128xf32> to vector<1x32x128xf32>
    tpu.vector_store %arg7[%c0_12, %c0_13, %c0_14], %21 {strides = array<i32>} : memref<1x32x128xf32, #tpu.memory_space<vmem>>, vector<1x32x128xf32>,
    return
  }
  func.func @transform_0(%arg0: i32, %arg1: i32, %arg2: i32) -> (i32, i32) {
    %c0_i32 = arith.constant 0 : i32
    %c0_i32_0 = arith.constant 0 : i32
    return %arg1, %c0_i32 : i32, i32
  }
  func.func @transform_1(%arg0: i32, %arg1: i32, %arg2: i32) -> (i32, i32, i32) {
    %c0_i32 = arith.constant 0 : i32
    %c0_i32_0 = arith.constant 0 : i32
    return %arg0, %c0_i32, %arg2 : i32, i32, i32
  }
  func.func @transform_2(%arg0: i32, %arg1: i32, %arg2: i32) -> (i32, i32, i32) {
    %c0_i32 = arith.constant 0 : i32
    return %arg0, %arg1, %arg2 : i32, i32, i32
  }
  func.func @transform_3(%arg0: i32, %arg1: i32, %arg2: i32) -> (i32, i32, i32) {
    %c0_i32 = arith.constant 0 : i32
    return %arg0, %arg1, %arg2 : i32, i32, i32
  }
  func.func @transform_4(%arg0: i32, %arg1: i32, %arg2: i32) -> (i32, i32, i32) {
    %c0_i32 = arith.constant 0 : i32
    return %arg0, %arg1, %arg2 : i32, i32, i32
  }
}

</mosaic_0001>

<bundles_post_ra>
// kernel: _tsr_decomp_jit.1
= control target key start
LH: loop header
LB: loop body
LE: loop exit
PB: predicated region body
PF: predicated region fallthrough
CT: control target
= control target key end

     0   :  { %s1776_s0 = inlined_call_operand.hbm [shape: f32[128,64], index: 0, kind: input, shape index: {}]   ;;  %s1777_s1 = inlined_call_operand.hbm [shape: f32[2,64,128], index: 1, kind: input, shape index: {}]   ;;  %s1778_s2 = inlined_call_operand.hbm [shape: f32[2,64,128], index: 2, kind: output, shape index: {0}]   ;;  %s1779_s3 = inlined_call_operand.hbm [shape: f32[2,64,128], index: 3, kind: output, shape index: {1}]   ;;  %s1780_s4 = inlined_call_operand.hbm [shape: f32[2,64,128], index: 4, kind: output, shape index: {2}]  }
   0x1   :  { %1798 = sst [smem:[#allocation22_spill]] %s1776_s0 }
   0x2   :  { %1799 = sst [smem:[#allocation23_spill]] %s1777_s1 }
   0x3   :  { %1800 = sst [smem:[#allocation24_spill]] %s1780_s4 }
   0x4   :  { %10 = vsyncpa [#allocation3], 0 }
   0x5   :  { %12 = vsyncpa [#allocation3 + $0x1], 0 }
   0x6   :  { %13 = vsyncpa [#allocation6], 0 }
   0x7   :  { %15 = vsyncpa [#allocation6 + $0x1], 0 }
   0x8   :  { %16 = vsyncpa [#allocation4], 0 }
   0x9   :  { %18 = vsyncpa [#allocation4 + $0x1], 0 }
   0xa   :  { %19 = vsyncpa [#allocation9], 0 }
   0xb   :  { %21 = vsyncpa [#allocation9 + $0x1], 0  ;;  %s1296_s15 = smov 0   ;;  %s1298_s16 = smov 0  }
   0xc   :  { %s1300_s17 = smov 0   ;;  %s1302_s18 = smov 0  }
   0xd   :  { %s1304_s19 = smov 0   ;;  %s1306_s20 = smov 0  }
   0xe   :  { %s1308_s21 = smov 0   ;;  %s1310_s22 = smov 0  }
   0xf   :  { %s1312_s23 = smov 0   ;;  %s1314_s24 = smov 0  }
  0x10   :  { %s1316_s25 = smov 0   ;;  %s1318_s26 = smov 0  }
  0x11   :  { %s1320_s27 = smov 0   ;;  %s1322_s28 = smov 0  }
  0x12 LB: > { %1801 = sst [smem:[#allocation15_spill]] %s1236_s22  ;;  %s42_s29 = sadd.s32 1, %s1252_s26  ;;  %s1260_s28 = sphi %s1322_s28, %s27_s28   ;;  %s1256_s27 = sphi %s1320_s27, %s1838_s27   ;;  %s1252_s26 = sphi %s1318_s26, %s1837_s26   ;;  %s1248_s25 = sphi %s1316_s25, %s1836_s25   ;;  %s1244_s24 = sphi %s1314_s24, %s1835_s24   ;;  %s1240_s23 = sphi %s1312_s23, %s1834_s23   ;;  %s1236_s22 = sphi %s1310_s22, %s1833_s22   ;;  %s1232_s21 = sphi %s1308_s21, %s1832_s21   ;;  %s1228_s20 = sphi %s1306_s20, %s1844_s20   ;;  %s1224_s19 = sphi %s1304_s19, %s1843_s19   ;;  %s1220_s18 = sphi %s1302_s18, %s1842_s18   ;;  %s1216_s17 = sphi %s1300_s17, %s1841_s17   ;;  %s1212_s16 = sphi %s1298_s16, %s1840_s16   ;;  %s1208_s15 = sphi %s1296_s15, %s1839_s15  }
  0x13   : > { %1802 = sst [smem:[#allocation16_spill]] %s1240_s23  ;;  %s1366_s30 = sadd.s32 4294967295, %s1260_s28  }
  0x14   : > { %1803 = sst [smem:[#allocation17_spill]] %s1252_s26  ;;  %p1368_p0 = scmp.ge.s32.totalorder %s42_s29, 2 }
  0x15   : > { %1804 = sst [smem:[#allocation18_spill]] %s1256_s27  ;;  %p60_p1 = scmp.ne.s32.totalorder %s1240_s23, %s1236_s22 }
  0x16   : > { %p1785_p2 = scmp.eq.s32.totalorder %s1260_s28, 0  ;;  %s1846_s29 = smov (%p1368_p0, %s42_s29), 0 }
  0x17   : > { %1806 = sst [smem:[#allocation19_spill]] %s1846_s29  ;;  %s53_s6 = sadd.s32 1, %s1240_s23 }
  0x18   : > { %p66_p3 = scmp.ne.s32.totalorder %s1236_s22, %s1232_s21  ;;  %s1383_s7 = ssub.s32 %s1252_s26, %s1846_s29 }
  0x19   : > { %p1786_p4 = scmp.eq.s32.totalorder %s1366_s30, 0  ;;  %p51_p5 = scmp.eq.s32.totalorder %s1383_s7, 0 }
  0x1a   : > { %p62_p6 = por %p1785_p2, %p60_p1  ;;  %p1784_p8 = scmp.lt.s32.totalorder %s1260_s28, 4 }
  0x1b   : > { %p1391_p7 = por %p1786_p4, %p66_p3  ;;  %s208_s10 = sand.u32 1, %s1240_s23  }
  0x1c   : > { %s1396_s9 = scalar_select %p51_p5, %s1240_s23, %s53_s6  }
  0x1d   : > { %s1807_s8 = scalar_select %p1391_p7, 1, 0 }
  0x1e   : > { %1808 = sst [smem:[#allocation20_spill]] %s1396_s9  ;;  %s740_s11 = sshll.u32 %s208_s10, 6 }
  0x1f   : > { %s775_s12 = sshll.u32 %s1252_s26, 10  ;;  %s1809_s0 = sld [smem:[#allocation22_spill]] }
  0x20   : > { %s212_s29 = scalar_lea.vmem [#allocation2], %s740_s11  ;;  %p1410_p9 = pnand %p1784_p8, %p62_p6 }
  0x21   : > { %s219_s4 = sshll.u32 %s212_s29, 4  ;;  %s1415_s26 = scalar_lea.sflag [#allocation3], %s208_s10  ;;  %s1406_s4 = int_to_ptr.vmem [resolvable:$true] %s219_s4 }
  0x22   : > { %p992_p12 = pneg %p1410_p9 }
  0x25   : > { %s1404_s21 = scalar_lea.hbm %s1809_s0, %s775_s12  ;;  %s995_s13 = scalar_lea.hbm %s1809_s0, 2048 }
  0x26   : > { %s990_s12 = scalar_lea.hbm %s1404_s21, 1024  ;;  %p996_p3 = scmp.lt.u32.totalorder %s1404_s21, %s1809_s0 }
  0x27   : > { %p991_p11 = scmp.ne.s32.totalorder %s1404_s21, %s990_s12  ;;  %p997_p5 = scmp.lt.u32.totalorder %s995_s13, %s990_s12 }
  0x28   : > { %p999_p8 = scmp.lt.u32.totalorder %s990_s12, %s1404_s21 }
  0x29   : > { %p993_p13 = pnand %p992_p12, %p991_p11  ;;  %p998_p6 = por %p997_p5, %p996_p3 }
  0x2b   : > { %p994_p1 = pneg %p993_p13  ;;  %p1000_p2 = por %p999_p8, %p998_p6 }
  0x2d   : > { %p1001_p4 = pnand %p1000_p2, %p994_p1 }
  0x2f   : > { %1004 = shalt.err (!%p1001_p4)
}
  0x30   : > { %s1005_s10 = scalar_lea.vmem %s1406_s4, 1024  ;;  %s1262_s29 = smov [#allocation2]  }
  0x31   : > { %p1006_p11 = scmp.ne.s32.totalorder %s1406_s4, %s1005_s10  ;;  %s1010_s11 = sshll.u32 %s1262_s29, 4  ;;  %s1011_s11 = int_to_ptr.vmem [resolvable:$false] %s1010_s11 }
  0x32   : > { %s1012_s9 = scalar_lea.vmem %s1011_s11, 2048  ;;  %p1013_p7 = scmp.lt.s32.totalorder %s1406_s4, %s1011_s11 }
  0x33   : > { %p1008_p13 = pnand %p1006_p11, %p992_p12  ;;  %p1014_p3 = scmp.lt.s32.totalorder %s1012_s9, %s1005_s10 }
  0x35   : > { %p1009_p10 = pneg %p1008_p13  ;;  %p1015_p5 = por %p1014_p3, %p1013_p7 }
  0x37   : > { %p1016_p8 = pnand %p1015_p5, %p1009_p10 }
  0x39   : > { %1019 = shalt.err (!%p1016_p8)
}
  0x3a   : > { %s1788_s12 = smov 128   ;;  %s1789_s13 = smov 8  }
  0x3b   : > { %858 = dma.hbm_to_vmem [thread:$0]  (!%p1410_p9), %s1404_s21, 1024, %s1406_s4, %s1415_s26, %s1788_s12, %s1788_s12, %s1789_s13  }
  0x3c   : > { %p122_p2 = scmp.eq.s32.totalorder %s1366_s30, 3  ;;  %p249_p4 = scmp.lt.s32.totalorder %s1260_s28, 5 }
  0x3d   : > { %p1811_p7 = scmp.ge.s32.totalorder %s1260_s28, 1  ;;  %s46_s10 = sadd.s32 1, %s1256_s27 }
  0x3e   : > { %s1848_s10 = smov (!%p1368_p0, %s46_s10), %s1256_s27  ;;  %s1792_s6 = sadd.s32 4294967294, %s1260_s28  }
  0x3f   : > { %p1450_p10 = pnand %p1811_p7, %p249_p4  ;;  %s81_s29 = sadd.s32 1, %s1228_s20 }
  0x40   : > { %p48_p9 = scmp.ge.s32.totalorder %s1848_s10, 2  ;;  %p94_p12 = scmp.ne.s32.totalorder %s1224_s19, %s1220_s18 }
  0x41   : > { %p88_p1 = scmp.ne.s32.totalorder %s1228_s20, %s1224_s19  ;;  %s111_s4 = sadd.s32 1, %s1216_s17 }
  0x42   : > { %s1850_s10 = smov (%p48_p9, %s1848_s10), 0  ;;  %p1814_p6 = scmp.eq.s32.totalorder %s1366_s30, 0 }
  0x43   : > { %1813 = sst [smem:[#allocation21_spill]] %s1850_s10  ;;  %p121_p0 = scmp.ne.s32.totalorder %s1216_s17, %s1212_s16 }
  0x44   : > { %p1469_p11 = por %p94_p12, %p1814_p6  ;;  %s76_s5 = ssub.s32 %s1256_s27, %s1850_s10 }
  0x45   : > { %p127_p13 = scmp.ne.s32.totalorder %s1212_s16, %s1208_s15  ;;  %p79_p3 = scmp.eq.s32.totalorder %s76_s5, 0 }
  0x46   : > { %s1815_s26 = scalar_select %p1469_p11, 1, 0 }
  0x47   : > { %s106_s18 = sor.u32 %s76_s5, %s1383_s7  ;;  %p1482_p8 = por %p122_p2, %p121_p0 }
  0x48   : > { %p109_p5 = scmp.eq.s32.totalorder %s106_s18, 0  ;;  %p128_p4 = scmp.eq.s32.totalorder %s1792_s6, 3 }
  0x49   : > { %s1816_s21 = scalar_select %p1482_p8, 1, 0 }
  0x4a   : > { %s1487_s11 = scalar_select %p79_p3, %s1228_s20, %s81_s29  }
  0x4b   : > { %s1490_s9 = scalar_select %p109_p5, %s1216_s17, %s111_s4  }
  0x4c   : > { %s229_s12 = sand.u32 1, %s1228_s20   ;;  %p1817_p7 = scmp.eq.s32.totalorder %s1260_s28, 0 }
  0x4d   : > { %s743_s13 = sshll.u32 %s229_s12, 6  ;;  %p1500_p12 = por %p128_p4, %p127_p13 }
  0x4e   : > { %p90_p9 = por %p88_p1, %p1817_p7  ;;  %s776_s7 = sshll.u32 %s1256_s27, 10 }
  0x4f   : > { %s1818_s0 = scalar_select %p1500_p12, 1, 0 }
  0x50   : > { %s233_s5 = scalar_lea.vmem [#allocation5], %s743_s13  ;;  %s1819_s1 = sld [smem:[#allocation23_spill]] }
  0x51   : > { %s241_s18 = sshll.u32 %s233_s5, 4  ;;  %p1820_p2 = scmp.lt.s32.totalorder %s1260_s28, 4  ;;  %s1510_s18 = int_to_ptr.vmem [resolvable:$true] %s241_s18 }
  0x52   : > { %s1518_s13 = scalar_lea.sflag [#allocation6], %s229_s12 }
  0x53   : > { %p1514_p1 = pnand %p1820_p2, %p90_p9 }
  0x55   : > { %p1022_p0 = pneg %p1514_p1 }
  0x56   : > { %s1508_s29 = scalar_lea.hbm %s1819_s1, %s776_s7  ;;  %s1025_s7 = scalar_lea.hbm %s1819_s1, 2048 }
  0x57   : > { %s1020_s5 = scalar_lea.hbm %s1508_s29, 1024  ;;  %p1026_p5 = scmp.lt.u32.totalorder %s1508_s29, %s1819_s1 }
  0x58   : > { %p1021_p6 = scmp.ne.s32.totalorder %s1508_s29, %s1020_s5  ;;  %p1027_p4 = scmp.lt.u32.totalorder %s1025_s7, %s1020_s5 }
  0x59   : > { %p1029_p9 = scmp.lt.u32.totalorder %s1020_s5, %s1508_s29 }
  0x5a   : > { %p1023_p13 = pnand %p1022_p0, %p1021_p6  ;;  %p1028_p7 = por %p1027_p4, %p1026_p5 }
  0x5c   : > { %p1024_p3 = pneg %p1023_p13  ;;  %p1030_p2 = por %p1029_p9, %p1028_p7 }
  0x5e   : > { %p1031_p12 = pnand %p1030_p2, %p1024_p3 }
  0x60   : > { %1034 = shalt.err (!%p1031_p12)
}
  0x61   : > { %s1035_s12 = scalar_lea.vmem %s1510_s18, 1024  ;;  %s1265_s23 = smov [#allocation5]  }
  0x62   : > { %p1036_p6 = scmp.ne.s32.totalorder %s1510_s18, %s1035_s12  ;;  %s1040_s10 = sshll.u32 %s1265_s23, 4  ;;  %s1041_s10 = int_to_ptr.vmem [resolvable:$false] %s1040_s10 }
  0x63   : > { %s1042_s27 = scalar_lea.vmem %s1041_s10, 2048  ;;  %p1043_p11 = scmp.lt.s32.totalorder %s1510_s18, %s1041_s10 }
  0x64   : > { %p1038_p13 = pnand %p1036_p6, %p1022_p0  ;;  %p1044_p5 = scmp.lt.s32.totalorder %s1042_s27, %s1035_s12 }
  0x66   : > { %p1039_p8 = pneg %p1038_p13  ;;  %p1045_p4 = por %p1044_p5, %p1043_p11 }
  0x68   : > { %p1046_p7 = pnand %p1045_p4, %p1039_p8 }
  0x6a   : > { %1049 = shalt.err (!%p1046_p7)
}
  0x6b   : > { %s1822_s6 = smov 8   ;;  %s1823_s5 = smov 128  }
  0x6c   : > { %861 = dma.hbm_to_vmem [thread:$0]  (!%p1514_p1), %s1508_s29, 1024, %s1510_s18, %s1518_s13, %s1823_s5, %s1823_s5, %s1822_s6  }
  0x6d   : > { %253 = sbr.rel (%p1450_p10) target bundleno = 425 (0x1a9), region = 28  ;;  %s255_s7 = sand.u32 (!%p1450_p10), 1, %s1236_s22  }
  0x6e   : > { %s747_s23 = sshll.u32 (!%p1450_p10), %s255_s7, 6  ;;  %s256_s12 = scalar_lea.sflag (!%p1450_p10), [#allocation3], %s255_s7 }
  0x6f   : > { %s1552_s10 = scalar_lea.vmem (!%p1450_p10), [#allocation2], %s747_s23  ;;  %p1824_p11 = scmp.ne.s32.totalorder (!%p1450_p10), %s1807_s8, 0 }
  0x74   : > { %1191 = dma.done.wait (%p1824_p11), %s256_s12, 1024  }
  0x75   : > { %1193 = vsyncadd (%p1824_p11), %s256_s12, 4294966272  ;;  %s264_s4 = sand.u32 1, %s1224_s19   ;;  %p1825_p10 = scmp.ne.s32.totalorder %s1815_s26, 0 }
  0x76   : > { %s748_s27 = sshll.u32 %s264_s4, 6  ;;  %s265_s18 = scalar_lea.sflag [#allocation6], %s264_s4 }
  0x77   : > { %s1559_s29 = scalar_lea.vmem [#allocation5], %s748_s27 }
  0x78   : > { %1195 = dma.done.wait (%p1825_p10), %s265_s18, 1024  }
  0x79   : > { %1197 = vsyncadd (%p1825_p10), %s265_s18, 4294966272  ;;  %v320_v0 = vld [vmem:[%s1559_s29] sm:$0xff]  ;;  %v321_v1 = vld [vmem:[%s1559_s29 + $0x8] sm:$0xff]  ;;  %vm328_vm0 = vcmask 523264   ;;  %s1796_s8 = sand.u32 1, %s1212_s16   ;;  %s760_s14 = sshll.u32 %s1244_s24, 5 }
  0x7a   : > { %v322_v2 = vld [vmem:[%s1559_s29 + $0x10] sm:$0xff]  ;;  %v821_v3 = vpack.c.bf16 %v321_v1, %v320_v0  ;;  %v323_v4 = vld [vmem:[%s1559_s29 + $0x18] sm:$0xff]  ;;  %v324_v6 = vld [vmem:[%s1559_s29 + $0x20] sm:$0xff]  ;;  %s749_s26 = sshll.u32 %s1796_s8, 5  ;;  %s459_s13 = scalar_lea.vmem %s1559_s29, %s760_s14 [#allocation5] }
  0x7b   : > { %v825_v5 = vpack.c.bf16 %v323_v4, %v322_v2  ;;  %v325_v7 = vld [vmem:[%s1559_s29 + $0x28] sm:$0xff]  ;;  %v312_v8 = vld [vmem:[%s1552_s10] sm:$0xff]  ;;  %v326_v11 = vld [vmem:[%s1559_s29 + $0x30] sm:$0xff]  ;;  %s764_s6 = sshll.u32 %s1244_s24, 2  ;;  %s765_s5 = sshll.u32 %s1248_s25, 3 }
  0x7c   : > { %822 = vmatprep.subr.bf16.mxu0 %v821_v3  ;;  %837 = vmatprep.subr.bf16.mxu1 %v821_v3  ;;  %v316_v9 = vld [vmem:[%s1552_s10 + $0x20] sm:$0xff]  ;;  %v829_v10 = vpack.c.bf16 %v325_v7, %v324_v6  ;;  %v327_v12 = vld [vmem:[%s1559_s29 + $0x38] sm:$0xff]  ;;  %v313_v14 = vld [vmem:[%s1552_s10 + $0x8] sm:$0xff]  ;;  %s508_s7 = sadd.s32 %s765_s5, %s764_s6  ;;  %s1596_s23 = scalar_lea.vmem [#allocation8], %s749_s26 }
  0x7d   : > { %824 = vmatpush3.bf16.msra.mxu0 %v821_v3  ;;  %841 = vmatpush3.bf16.msra.mxu1 %v821_v3  ;;  %v833_v13 = vpack.c.bf16 %v327_v12, %v326_v11  ;;  %v317_v15 = vld [vmem:[%s1552_s10 + $0x28] sm:$0xff]  ;;  %v314_v16 = vld [vmem:[%s1552_s10 + $0x10] sm:$0xff]  ;;  %v315_v18 = vld [vmem:[%s1552_s10 + $0x18] sm:$0xff]  ;;  %s530_s12 = sshll.u32 %s1596_s23, 4  ;;  %s489_s27 = sand.u32 1, %s1366_s30   ;;  %s1606_s12 = int_to_ptr.vmem [resolvable:$true] %s530_s12 }
  0x7e   : > { %826 = vmatprep.subr.bf16.mxu0 %v825_v5  ;;  %838 = vmatprep.subr.bf16.mxu1 %v825_v5  ;;  %v318_v17 = vld [vmem:[%s1552_s10 + $0x30] sm:$0xff]  ;;  %v319_v19 = vld [vmem:[%s1552_s10 + $0x38] sm:$0xff]  ;;  %v461_v20 = vld [vmem:[%s459_s13 + $0x8] sm:$0xff]  ;;  %s1599_s10 = scalar_lea.vmem [#allocation7], %s749_s26  ;;  %s766_s24 = sshll.u32 %s508_s7, 7 }
  0x7f   : > { %809 = vmatprep.mubr.msk.f32.mxu0 %vm328_vm0, %v312_v8  ;;  %815 = vmatprep.mubr.msk.f32.mxu1 %vm328_vm0, %v316_v9  ;;  %v460_v21 = vld [vmem:[%s459_s13] sm:$0xff]  ;;  %s511_s4 = sshll.u32 %s1599_s10, 4  ;;  %s1608_s25 = scalar_lea.vmem [#allocation10], %s749_s26  ;;  %v463_v28 = vld [vmem:[%s459_s13 + $0x18] sm:$0xff]  ;;  %v462_v30 = vld [vmem:[%s459_s13 + $0x10] sm:$0xff]  ;;  %s1617_s4 = int_to_ptr.vmem [resolvable:$true] %s511_s4 }
  0x80   : > { %s549_s18 = sshll.u32 %s1608_s25, 4  ;;  %s1615_s6 = scalar_lea.hbm %s1779_s3, %s766_s24  ;;  %s1627_s18 = int_to_ptr.vmem [resolvable:$true] %s549_s18 }
  0x81   : > { %828 = vmatpush3.bf16.msra.mxu0 %v825_v5  ;;  %842 = vmatpush3.bf16.msra.mxu1 %v825_v5  ;;  %s1625_s5 = scalar_lea.hbm %s1778_s2, %s766_s24  ;;  %s1826_s14 = sld [smem:[#allocation24_spill]] }
  0x82   : > { %830 = vmatprep.subr.bf16.mxu0 %v829_v10  ;;  %839 = vmatprep.subr.bf16.mxu1 %v829_v10  ;;  %s1639_s1 = scalar_lea.sflag [#allocation9], %s489_s27  ;;  %s1050_s22 = scalar_lea.vmem %s1606_s12, 512 }
  0x83   : > { %p1051_p8 = scmp.ne.s32.totalorder %s1606_s12, %s1050_s22  ;;  %p1827_p12 = scmp.ne.s32.totalorder %s1816_s21, 0 }
  0x84   : > { %s1266_s26 = smov [#allocation8]  }
  0x85   : > { %832 = vmatpush3.bf16.msra.mxu0 %v829_v10  ;;  %843 = vmatpush3.bf16.msra.mxu1 %v829_v10  ;;  %p1052_p1 = pnand %p1051_p8, %p1827_p12  ;;  %s1054_s13 = sshll.u32 %s1266_s26, 4  ;;  %s1055_s13 = int_to_ptr.vmem [resolvable:$false] %s1054_s13 }
  0x86   : > { %834 = vmatprep.subr.bf16.mxu0 %v833_v13  ;;  %840 = vmatprep.subr.bf16.mxu1 %v833_v13  ;;  %p1057_p3 = scmp.lt.s32.totalorder %s1606_s12, %s1055_s13 }
  0x87   : > { %s1635_s8 = scalar_lea.hbm %s1826_s14, %s766_s24  ;;  %p1053_p0 = pneg %p1052_p1 }
  0x89   : > { %836 = vmatpush3.bf16.msra.mxu0 %v833_v13  ;;  %844 = vmatpush3.bf16.msra.mxu1 %v833_v13 }
  0x8c   : > { %810 = vmatmul.mubr.msk.f32.vlgmr.msra.gmra.mrb[0].mxu0 %vm328_vm0, %v313_v14  ;;  %816 = vmatmul.mubr.msk.f32.vlgmr.msra.gmra.mrb[0].mxu1 %vm328_vm0, %v317_v15 }
  0x8d   : > { %812 = vmatprep.mubr.msk.f32.mxu0 %vm328_vm0, %v314_v16  ;;  %818 = vmatprep.mubr.msk.f32.mxu1 %vm328_vm0, %v318_v17 }
  0x90   : > { %813 = vmatmul.mubr.msk.f32.gmra.mrb[2].mxu0 %vm328_vm0, %v315_v18  ;;  %819 = vmatmul.mubr.msk.f32.gmra.mrb[2].mxu1 %vm328_vm0, %v319_v19 }
 0x15f   : > { %v811_v22 = vpop.f32.mrb[0].mxu0  ;;  %v817_v23 = vpop.f32.mrb[0].mxu1 }
 0x160   : > { %465 = vst [vmem:[%s1599_s10 + $0x8] sm:$0xff] %v811_v22  ;;  %v473_v24 = vsub.f32 %v461_v20, %v811_v22  ;;  %v419_v25 = vpop.f32.mrb[1].mxu0  ;;  %469 = vst [vmem:[%s1596_s23 + $0x8] sm:$0xff] %v817_v23  ;;  %v439_v26 = vpop.f32.mrb[1].mxu1 }
 0x161   : > { %464 = vst [vmem:[%s1599_s10] sm:$0xff] %v419_v25  ;;  %v472_v27 = vsub.f32 %v460_v21, %v419_v25  ;;  %468 = vst [vmem:[%s1596_s23] sm:$0xff] %v439_v26 }
 0x162   : > { %v477_v29 = vsub.f32 %v473_v24, %v817_v23 }
 0x163   : > { %v476_v31 = vsub.f32 %v472_v27, %v439_v26  ;;  %v814_v32 = vpop.f32.mrb[2].mxu0  ;;  %v820_v33 = vpop.f32.mrb[2].mxu1 }
 0x164   : > { %481 = vst [vmem:[%s1608_s25 + $0x8] sm:$0xff] %v477_v29  ;;  %467 = vst [vmem:[%s1599_s10 + $0x18] sm:$0xff] %v814_v32  ;;  %v475_v34 = vsub.f32 %v463_v28, %v814_v32  ;;  %v429_v35 = vpop.f32.mrb[3].mxu0  ;;  %v449_v36 = vpop.f32.mrb[3].mxu1 }
 0x165   : > { %471 = vst [vmem:[%s1596_s23 + $0x18] sm:$0xff] %v820_v33  ;;  %480 = vst [vmem:[%s1608_s25] sm:$0xff] %v476_v31  ;;  %v474_v37 = vsub.f32 %v462_v30, %v429_v35 }
 0x166   : > { %466 = vst [vmem:[%s1599_s10 + $0x10] sm:$0xff] %v429_v35  ;;  %470 = vst [vmem:[%s1596_s23 + $0x10] sm:$0xff] %v449_v36  ;;  %v479_v38 = vsub.f32 %v475_v34, %v820_v33  ;;  %s1056_s10 = scalar_lea.vmem %s1055_s13, 1024 }
 0x167   : > { %p1058_p9 = scmp.lt.s32.totalorder %s1056_s10, %s1050_s22 }
 0x169   : > { %p1059_p2 = por %p1058_p9, %p1057_p3 }
 0x16b   : > { %p1060_p6 = pnand %p1059_p2, %p1053_p0 }
 0x16d   : > { %1063 = shalt.err (!%p1060_p6)
}
 0x16e   : > { %s1064_s30 = scalar_lea.hbm %s1615_s6, 512  ;;  %s1068_s24 = scalar_lea.hbm %s1779_s3, 2048 }
 0x16f   : > { %p1065_p13 = scmp.ne.s32.totalorder %s1615_s6, %s1064_s30  ;;  %p1069_p7 = scmp.lt.u32.totalorder %s1615_s6, %s1779_s3 }
 0x170   : > { %p1070_p11 = scmp.lt.u32.totalorder %s1068_s24, %s1064_s30  ;;  %p1072_p8 = scmp.lt.u32.totalorder %s1064_s30, %s1615_s6 }
 0x171   : > { %p1066_p5 = pnand %p1065_p13, %p1827_p12 }
 0x172   : > { %p1071_p10 = por %p1070_p11, %p1069_p7 }
 0x173   : > { %p1067_p4 = pneg %p1066_p5 }
 0x174   : > { %p1073_p1 = por %p1072_p8, %p1071_p10 }
 0x176   : > { %p1074_p0 = pnand %p1073_p1, %p1067_p4 }
 0x178   : > { %1077 = shalt.err (!%p1074_p0)
}
 0x179   : > { %s1267_s22 = smov 128   ;;  %s1268_s26 = smov 8   ;;  %v478_v39 = vsub.f32 %v474_v37, %v449_v36 }
 0x17a   : > { %850 = dma.vmem_to_hbm [thread:$0]  (%p1827_p12), %s1606_s12, 512, %s1615_s6, %s1639_s1, %s1267_s22, %s1267_s22, %s1268_s26  }
 0x17b   : > { %s1828_s13 = sand.u32 1, %s1212_s16   ;;  %s1078_s30 = scalar_lea.vmem %s1617_s4, 512 }
 0x17c   : > { %s1668_s10 = scalar_lea.sflag [#allocation4], %s1828_s13  ;;  %p1079_p3 = scmp.ne.s32.totalorder %s1617_s4, %s1078_s30 }
 0x17d   : > { %s1269_s23 = smov [#allocation7]  }
 0x17e   : > { %p1080_p9 = pnand %p1079_p3, %p1827_p12  ;;  %s1082_s27 = sshll.u32 %s1269_s23, 4  ;;  %s1083_s27 = int_to_ptr.vmem [resolvable:$false] %s1082_s27 }
 0x17f   : > { %s1084_s24 = scalar_lea.vmem %s1083_s27, 1024  ;;  %p1085_p6 = scmp.lt.s32.totalorder %s1617_s4, %s1083_s27 }
 0x180   : > { %p1081_p2 = pneg %p1080_p9  ;;  %p1086_p13 = scmp.lt.s32.totalorder %s1084_s24, %s1078_s30 }
 0x182   : > { %p1087_p5 = por %p1086_p13, %p1085_p6 }
 0x184   : > { %p1088_p4 = pnand %p1087_p5, %p1081_p2 }
 0x186   : > { %1091 = shalt.err (!%p1088_p4)
}
 0x187   : > { %s1092_s12 = scalar_lea.hbm %s1625_s5, 512  ;;  %s1096_s29 = scalar_lea.hbm %s1778_s2, 2048 }
 0x188   : > { %p1093_p7 = scmp.ne.s32.totalorder %s1625_s5, %s1092_s12  ;;  %p1097_p8 = scmp.lt.u32.totalorder %s1625_s5, %s1778_s2 }
 0x189   : > { %p1098_p1 = scmp.lt.u32.totalorder %s1096_s29, %s1092_s12  ;;  %p1100_p3 = scmp.lt.u32.totalorder %s1092_s12, %s1625_s5 }
 0x18a   : > { %p1094_p11 = pnand %p1093_p7, %p1827_p12 }
 0x18b   : > { %p1099_p0 = por %p1098_p1, %p1097_p8 }
 0x18c   : > { %p1095_p10 = pneg %p1094_p11 }
 0x18d   : > { %p1101_p9 = por %p1100_p3, %p1099_p0 }
 0x18f   : > { %p1102_p2 = pnand %p1101_p9, %p1095_p10 }
 0x191   : > { %1105 = shalt.err (!%p1102_p2)
}
 0x192   : > { %849 = dma.vmem_to_hbm [thread:$0]  (%p1827_p12), %s1617_s4, 512, %s1625_s5, %s1668_s10, %s1267_s22, %s1267_s22, %s1268_s26  }
 0x193   : > { %483 = vst [vmem:[%s1608_s25 + $0x18] sm:$0xff] %v479_v38  ;;  %482 = vst [vmem:[%s1608_s25 + $0x10] sm:$0xff] %v478_v39  ;;  %s1106_s30 = scalar_lea.vmem %s1627_s18, 512  ;;  %s1270_s27 = smov [#allocation10]  }
 0x194   : > { %p1107_p6 = scmp.ne.s32.totalorder %s1627_s18, %s1106_s30  ;;  %s1110_s24 = sshll.u32 %s1270_s27, 4  ;;  %s1111_s24 = int_to_ptr.vmem [resolvable:$false] %s1110_s24 }
 0x195   : > { %s1112_s12 = scalar_lea.vmem %s1111_s24, 1024  ;;  %p1113_p4 = scmp.lt.s32.totalorder %s1627_s18, %s1111_s24 }
 0x196   : > { %p1108_p13 = pnand %p1107_p6, %p1827_p12  ;;  %p1114_p7 = scmp.lt.s32.totalorder %s1112_s12, %s1106_s30 }
 0x198   : > { %p1109_p5 = pneg %p1108_p13  ;;  %p1115_p11 = por %p1114_p7, %p1113_p4 }
 0x19a   : > { %p1116_p10 = pnand %p1115_p11, %p1109_p5 }
 0x19c   : > { %1119 = shalt.err (!%p1116_p10)
}
 0x19d   : > { %s1120_s4 = scalar_lea.hbm %s1635_s8, 512  ;;  %s1124_s10 = scalar_lea.hbm %s1826_s14, 2048 }
 0x19e   : > { %p1121_p8 = scmp.ne.s32.totalorder %s1635_s8, %s1120_s4  ;;  %p1125_p3 = scmp.lt.u32.totalorder %s1635_s8, %s1826_s14 }
 0x19f   : > { %p1126_p9 = scmp.lt.u32.totalorder %s1124_s10, %s1120_s4  ;;  %p1128_p6 = scmp.lt.u32.totalorder %s1120_s4, %s1635_s8 }
 0x1a0   : > { %p1122_p1 = pnand %p1121_p8, %p1827_p12 }
 0x1a1   : > { %p1127_p2 = por %p1126_p9, %p1125_p3 }
 0x1a2   : > { %p1123_p0 = pneg %p1122_p1 }
 0x1a3   : > { %p1129_p13 = por %p1128_p6, %p1127_p2 }
 0x1a5   : > { %p1130_p5 = pnand %p1129_p13, %p1123_p0 }
 0x1a7   : > { %1133 = shalt.err (!%p1130_p5)
}
 0x1a8   : > { %851 = dma.vmem_to_hbm [thread:$0]  (%p1827_p12), %s1627_s18, 512, %s1635_s8, %s1639_s1, %s1267_s22, %s1267_s22, %s1268_s26  }
 0x1a9 PF: > { %p873_p4 = scmp.ge.s32.totalorder %s1260_s28, 2  ;;  %s564_s29 = sand.u32 1, %s1208_s15  }
 0x1aa   : > { %p1829_p7 = scmp.ne.s32.totalorder %s1818_s0, 0  ;;  %s565_s13 = scalar_lea.sflag [#allocation4], %s564_s29 }
 0x1ac   : > { %p863_p11 = pnand %p873_p4, %p1829_p7 }
 0x1ae   : > { %1199 = dma.done.wait (!%p863_p11), %s565_s13, 512  }
 0x1af   : > { %1201 = vsyncadd (!%p863_p11), %s565_s13, 4294966784  ;;  %s1830_s21 = sadd.s32 4294967294, %s1260_s28  }
 0x1b0   : > { %s573_s23 = sand.u32 1, %s1830_s21  }
 0x1b1   : > { %s574_s30 = scalar_lea.sflag [#allocation9], %s573_s23 }
 0x1b2   : > { %1203 = dma.done.wait (!%p863_p11), %s574_s30, 1024  }
 0x1b3   : > { %1205 = vsyncadd (!%p863_p11), %s574_s30, 4294966272  ;;  %s27_s28 = sadd.s32 1, %s1260_s28   ;;  %s1832_s21 = sld [smem:[#allocation15_spill]] }
 0x1b4   : > { %p1729_p12 = scmp.ge.s32.totalorder %s27_s28, 6   ;;  %s1833_s22 = sld [smem:[#allocation16_spill]] }
 0x1b5   : > { %s1834_s23 = sld [smem:[#allocation20_spill]]  ;;  %s1835_s24 = sld [smem:[#allocation17_spill]] }
 0x1b6   : > { %s1836_s25 = sld [smem:[#allocation18_spill]]  ;;  %s1837_s26 = sld [smem:[#allocation19_spill]] }
 0x1b7   : > { %s1838_s27 = sld [smem:[#allocation21_spill]]  ;;  %s1839_s15 = smov %s1212_s16 }
 0x1b8   : > { %s1840_s16 = smov %s1216_s17  ;;  %s1841_s17 = smov %s1490_s9 }
 0x1b9   : > { %s1842_s18 = smov %s1224_s19  ;;  %s1843_s19 = smov %s1228_s20 }
 0x1ba   : > { %s1844_s20 = smov %s1487_s11  ;;  %26 = sbr.rel (!%p1729_p12) target bundleno = 18 (0x12), region = 119 }
 0x1c1   :  { %588 = vsyncpa [#allocation3], 1 }
 0x1c2   :  { %590 = vsyncpa [#allocation3 + $0x1], 1 }
 0x1c3   :  { %591 = vsyncpa [#allocation6], 1 }
 0x1c4   :  { %593 = vsyncpa [#allocation6 + $0x1], 1 }
 0x1c5   :  { %594 = vsyncpa [#allocation4], 1 }
 0x1c6   :  { %596 = vsyncpa [#allocation4 + $0x1], 1 }
 0x1c7   :  { %597 = vsyncpa [#allocation9], 1 }
 0x1c8   :  { %599 = vsyncpa [#allocation9 + $0x1], 1 }

</bundles_post_ra>
